<compile_context>
chip_gen: v6e
topology: v6e:2x2x1
jax: 0.10.0
libtpu: 0.0.40
codegen_flags: <defaults>
</compile_context>

<pallas_src>
import functools
import math

import jax
import jax.numpy as jnp
from jax.experimental import pallas as pl
from jax.experimental.pallas import tpu as pltpu


def _cdiv(a, b):
    return -(-a // b)


def _round_up(a, b):
    return _cdiv(a, b) * b


def _pick_block_rows(rows, lanes, itemsize):
    """Rows of the (rows, lanes) view processed per grid step.

    Small problems run as one full-array block (block dims == array dims is
    always layout-legal).  Larger problems use a multiple-of-128 row tile
    sized so the double-buffered input block plus the two f32 in-kernel
    temporaries (x, e) stay well under the 32 MiB scoped-VMEM limit that is
    safe on v5e/v6e/v7x, targeting >= ~8 grid steps (>= 4 per v7x TensorCore)
    once there is enough work and never dropping below 512-row tiles.
    """
    if rows <= 512:
        return rows
    per_row = lanes * (2 * itemsize + 2 * 4)   # 2x input buffers + 2 f32 temporaries
    tm_cap = max(128, ((12 << 20) // per_row) // 128 * 128)
    tm_want = max(512, _round_up(_cdiv(rows, 8), 128))
    return min(tm_cap, tm_want)


def _largest_packing(m, n):
    """Largest q with q*n <= 128 and q | m (so the packed reshape is copy-free)."""
    if n > 64:
        return 1
    for q in range(128 // n, 1, -1):
        if m % q == 0:
            return q
    return 1


# ----------------------------------------------------------------------------
# Packed path: q softmax rows share one lane row (q*n <= 128 lanes).
# ----------------------------------------------------------------------------
def _packed_kernel(x_ref, w_ref, o_ref, *, inv_temp, q):
    x = x_ref[...].astype(jnp.float32) * inv_temp          # (tm, L), L = q*n
    mx = jnp.max(x, axis=-1, keepdims=True)                # shared per-lane-row max
    e = jnp.exp(x - mx)                                    # EUP, dense lanes
    # One fused block-diagonal reduction on the otherwise-idle MXU:
    # columns [0:q) = per-segment sum (den), [q:2q) = coord-weighted sum (num).
    res = jnp.dot(e, w_ref[...], preferred_element_type=jnp.float32,
                  precision=jax.lax.Precision.HIGHEST)     # (tm, 2q)
    den = jnp.maximum(res[:, :q], jnp.float32(1e-30))      # NaN guard (underflow -> 0)
    num = res[:, q:]
    o_ref[...] = (num / den).astype(o_ref.dtype)           # tiny per-row divide


def _exp_centroid_packed(x2, coords, inv_temp, out_dtype, q):
    m, n = x2.shape
    L = q * n
    rows = m // q
    itemsize = jnp.dtype(x2.dtype).itemsize

    # Contiguous merge of adjacent rows -> copy-free reshape (no extra HBM pass).
    xp = x2.reshape(rows, L)

    # Fused block-diagonal reduction weight: [segment indicator | indicator*coords].
    seg = jnp.arange(L, dtype=jnp.int32) // n
    onehot = (seg[:, None] == jnp.arange(q, dtype=jnp.int32)[None, :]).astype(jnp.float32)
    c_tiled = jnp.tile(coords.astype(jnp.float32), q)
    w = jnp.concatenate([onehot, onehot * c_tiled[:, None]], axis=1)   # (L, 2q)

    tm = _pick_block_rows(rows, L, itemsize)
    grid = (_cdiv(rows, tm),)

    out = pl.pallas_call(
        functools.partial(_packed_kernel, inv_temp=inv_temp, q=q),
        out_shape=jax.ShapeDtypeStruct((rows, q), out_dtype),
        grid_spec=pltpu.PrefetchScalarGridSpec(
            num_scalar_prefetch=0,
            grid=grid,
            in_specs=[
                pl.BlockSpec((tm, L), lambda i: (i, 0)),        # packed logits rows
                pl.BlockSpec((L, 2 * q), lambda i: (0, 0)),     # shared fused weight
            ],
            out_specs=pl.BlockSpec((tm, q), lambda i: (i, 0)),
        ),
        compiler_params=pltpu.CompilerParams(
            dimension_semantics=("parallel",),
            vmem_limit_bytes=32 << 20,
        ),
        cost_estimate=pl.CostEstimate(
            flops=2 * rows * L * 2 * q + 5 * rows * L,
            transcendentals=rows * L,
            bytes_accessed=rows * L * itemsize
            + rows * q * jnp.dtype(out_dtype).itemsize
            + L * 2 * q * 4,
        ),
    )(xp, w)
    return out.reshape(m)


# ----------------------------------------------------------------------------
# Generic fallback: arbitrary n (one softmax row per vreg row).
# ----------------------------------------------------------------------------
def _row_kernel(x_ref, w_ref, o_ref, *, inv_temp):
    x = x_ref[...].astype(jnp.float32) * inv_temp          # (tm, n)
    mx = jnp.max(x, axis=-1, keepdims=True)
    e = jnp.exp(x - mx)
    # Both reductions fused into one MXU matmul: columns = [den, num].
    res = jnp.dot(e, w_ref[...], preferred_element_type=jnp.float32,
                  precision=jax.lax.Precision.HIGHEST)     # (tm, 2)
    den = jnp.maximum(res[:, 0:1], jnp.float32(1e-30))
    num = res[:, 1:2]
    o_ref[...] = (num / den).astype(o_ref.dtype)           # (tm, 1)


def _exp_centroid_rows(x2, coords, inv_temp, out_dtype):
    m, n = x2.shape
    itemsize = jnp.dtype(x2.dtype).itemsize
    w = jnp.stack([jnp.ones((n,), jnp.float32), coords.astype(jnp.float32)],
                  axis=1)                                   # (n, 2) = [ones | coords]

    tm = _pick_block_rows(m, n, itemsize)
    grid = (_cdiv(m, tm),)

    out = pl.pallas_call(
        functools.partial(_row_kernel, inv_temp=inv_temp),
        out_shape=jax.ShapeDtypeStruct((m, 1), out_dtype),
        grid_spec=pltpu.PrefetchScalarGridSpec(
            num_scalar_prefetch=0,
            grid=grid,
            in_specs=[
                pl.BlockSpec((tm, n), lambda i: (i, 0)),       # logits rows
                pl.BlockSpec((n, 2), lambda i: (0, 0)),        # shared reduction weight
            ],
            out_specs=pl.BlockSpec((tm, 1), lambda i: (i, 0)),
        ),
        compiler_params=pltpu.CompilerParams(
            dimension_semantics=("parallel",),
            vmem_limit_bytes=32 << 20,
        ),
        cost_estimate=pl.CostEstimate(
            flops=4 * m * n + 5 * m * n,
            transcendentals=m * n,
            bytes_accessed=m * n * itemsize
            + m * jnp.dtype(out_dtype).itemsize
            + n * 2 * 4,
        ),
    )(x2, w)
    return out.reshape(m)


def exp_centroid_1d(logits, coords, temperature, out_dtype=jnp.float32):
    """JAX/Pallas equivalent of ExpCentroid1d.forward (output kept in f32)."""
    *lead, n = logits.shape
    m = math.prod(lead) if lead else 1
    x2 = logits.reshape(m, n)                 # contiguous reshape: free
    inv_temp = 1.0 / float(temperature)

    q = _largest_packing(m, n)
    if q >= 2:
        out = _exp_centroid_packed(x2, coords, inv_temp, out_dtype, q)
    else:
        out = _exp_centroid_rows(x2, coords, inv_temp, out_dtype)
    return out.reshape(tuple(lead))


def _reference(logits, coords, temperature):
    p = jax.nn.softmax(logits / temperature, axis=-1)
    return jnp.sum(p * coords[None, :], axis=-1)


if __name__ == "__main__":
    key = jax.random.PRNGKey(0)
    temperature = 0.5
    B, S = 2, 8

    def check(logits, coords):
        out = jax.block_until_ready(exp_centroid_1d(logits, coords, temperature))
        ref = _reference(logits.astype(jnp.float32), coords, temperature)
        assert out.shape == ref.shape, (out.shape, ref.shape)
        assert jnp.allclose(out, ref, atol=1e-5, rtol=1e-5), (out, ref)

    k1, k2, k3 = jax.random.split(key, 3)

    # Module's native small-N case (N=16, divides 128): fully lane-packed path.
    N = 16
    logits = jax.random.normal(k1, (B, S, N), dtype=jnp.float32)
    coords = jnp.linspace(-1.0, 1.0, N, dtype=jnp.float32)
    check(logits, coords)

    # Same shapes, bf16 logits (producer-side dtype contract); output stays f32.
    check(logits.astype(jnp.bfloat16), coords)

    # N that does not divide 128 (N=20): still lane-packed, copy-free (q=4 here).
    N2 = 20
    logits2 = jax.random.normal(k2, (B, S, N2), dtype=jnp.float32)
    coords2 = jnp.linspace(-1.0, 1.0, N2, dtype=jnp.float32)
    check(logits2, coords2)

    # Large N (> 64): generic row-layout fallback with fused MXU reductions.
    N3 = 200
    logits3 = jax.random.normal(k3, (B, S, N3), dtype=jnp.float32)
    coords3 = jnp.linspace(-1.0, 1.0, N3, dtype=jnp.float32)
    check(logits3, coords3)

    print("KERNEL_OK")
</pallas_src>

<mosaic_0001>
module attributes {stable_mosaic.version = 11 : i64} {
  func.func @_packed_kernel(%arg0: i32, %arg1: memref<2x128xf32, #tpu.memory_space<vmem>>, %arg2: memref<128x16xf32, #tpu.memory_space<vmem>>, %arg3: memref<2x8xf32, #tpu.memory_space<vmem>>) attributes {dimension_semantics = [#tpu.dimension_semantics<parallel>], iteration_bounds = array<i64: 1>, scalar_prefetch = 0 : i64, scratch_operands = 0 : i64, tpu.core_type = #tpu.core_type<tc>, window_params = [{transform_indices = @transform_0, window_bounds = array<i64: 2, 128>}, {pipeline_mode = #tpu.pipeline_mode<synchronous>, transform_indices = @transform_1, window_bounds = array<i64: 128, 16>}, {transform_indices = @transform_2, window_bounds = array<i64: 2, 8>}]} {
    %c0 = arith.constant 0 : index
    %c0_0 = arith.constant 0 : index
    %0 = vector.load %arg1[%c0, %c0_0] : memref<2x128xf32, #tpu.memory_space<vmem>>, vector<2x128xf32>
    %cst = arith.constant 2.000000e+00 : f32
    %1 = vector.broadcast %cst : f32 to vector<2x128xf32>
    %2 = arith.mulf %0, %1 : vector<2x128xf32>
    %cst_1 = arith.constant dense<0xFF800000> : vector<2xf32>
    %3 = vector.multi_reduction <maximumf>, %2, %cst_1 [1] : vector<2x128xf32> to vector<2xf32>
    %4 = vector.shape_cast %3 : vector<2xf32> to vector<2x1xf32>
    %5 = vector.broadcast %4 : vector<2x1xf32> to vector<2x128xf32>
    %6 = arith.subf %2, %5 : vector<2x128xf32>
    %7 = math.exp %6 : vector<2x128xf32>
    %c0_2 = arith.constant 0 : index
    %c0_3 = arith.constant 0 : index
    %8 = vector.load %arg2[%c0_2, %c0_3] : memref<128x16xf32, #tpu.memory_space<vmem>>, vector<128x16xf32>
    %cst_4 = arith.constant dense<0.000000e+00> : vector<2x16xf32>
    %9 = tpu.matmul %7, %8, %cst_4 {dimension_numbers = #tpu.dot_dimension_numbers<[1], [0], [0], [1], [0, 0, 1, 1], [], []>, precision = #tpu.contract_precision<fp32>} : vector<2x128xf32>, vector<128x16xf32>, vector<2x16xf32> -> vector<2x16xf32>
    %10 = vector.extract_strided_slice %9 {offsets = [0, 0], sizes = [2, 8], strides = [1, 1]} : vector<2x16xf32> to vector<2x8xf32>
    %cst_5 = arith.constant 1.000000e-30 : f32
    %11 = vector.broadcast %cst_5 : f32 to vector<2x8xf32>
    %12 = arith.maximumf %10, %11 : vector<2x8xf32>
    %13 = vector.extract_strided_slice %9 {offsets = [0, 8], sizes = [2, 8], strides = [1, 1]} : vector<2x16xf32> to vector<2x8xf32>
    %14 = arith.divf %13, %12 : vector<2x8xf32>
    %c0_6 = arith.constant 0 : index
    %c0_7 = arith.constant 0 : index
    %15 = vector.load %arg3[%c0_6, %c0_7] : memref<2x8xf32, #tpu.memory_space<vmem>>, vector<2x8xf32>
    tpu.vector_store %arg3[%c0_6, %c0_7], %14 {strides = array<i32>} : memref<2x8xf32, #tpu.memory_space<vmem>>, vector<2x8xf32>,
    return
  }
  func.func @transform_0(%arg0: i32) -> (i32, i32) {
    %c0_i32 = arith.constant 0 : i32
    %c0_i32_0 = arith.constant 0 : i32
    return %arg0, %c0_i32 : i32, i32
  }
  func.func @transform_1(%arg0: i32) -> (i32, i32) {
    %c0_i32 = arith.constant 0 : i32
    %c0_i32_0 = arith.constant 0 : i32
    %c0_i32_1 = arith.constant 0 : i32
    return %c0_i32, %c0_i32_0 : i32, i32
  }
  func.func @transform_2(%arg0: i32) -> (i32, i32) {
    %c0_i32 = arith.constant 0 : i32
    %c0_i32_0 = arith.constant 0 : i32
    return %arg0, %c0_i32 : i32, i32
  }
}

</mosaic_0001>

<bundles_post_ra>
// kernel: tpu_custom_call.1
= control target key start
LH: loop header
LB: loop body
LE: loop exit
PB: predicated region body
PF: predicated region fallthrough
CT: control target
= control target key end

     0   :  { %vm14_vm0 = vcmask 1041408   ;;  %v1048_v4 = vmov 0.0   ;;  %s1486_s0 = inlined_call_operand.vmem [shape: f32[2,128], index: 0, kind: input, shape index: {}]   ;;  %s1487_s1 = inlined_call_operand.vmem [shape: f32[128,16], index: 1, kind: input, shape index: {}]   ;;  %s1488_s2 = inlined_call_operand.hbm [shape: f32[2,8], index: 2, kind: output, shape index: {}]  }
   0x1   :  { %v12_v0 = vld [vmem:[%s1486_s0] sm:$0x3]  ;;  %v36_v1 = vld [vmem:[%s1487_s1 + $0x78] sm:$0xff]  ;;  %v35_v2 = vld [vmem:[%s1487_s1 + $0x70] sm:$0xff]  ;;  %842 = vmatprep.subr.mxu1 %v1048_v4  ;;  %807 = vmatprep.subr.mxu0 %v1048_v4 }
   0x2   :  { %v1077_v3 = vmul.f32 2.0, %v12_v0  ;;  %v1080_v5 = vand.u32 4294901760, %v36_v1  ;;  %v1082_v6 = vand.u32 4294901760, %v35_v2  ;;  %v34_v7 = vld [vmem:[%s1487_s1 + $0x68] sm:$0xff]  ;;  %v33_v8 = vld [vmem:[%s1487_s1 + $0x60] sm:$0xff]  ;;  %v32_v9 = vld [vmem:[%s1487_s1 + $0x58] sm:$0xff] }
   0x3   :  { %v1094_v10 = vand.u32 4294901760, %v34_v7  ;;  %v1096_v11 = vand.u32 4294901760, %v33_v8  ;;  %v1098_v12 = vand.u32 4294901760, %v32_v9  ;;  %v31_v13 = vld [vmem:[%s1487_s1 + $0x50] sm:$0xff] }
   0x4   :  { %7 = vsyncpa [#allocation3], 0  ;;  %v15_v14 = vsel %vm14_vm0, %v1077_v3, -inf  ;;  %v1106_v15 = vsub.f32 %v36_v1, %v1080_v5  ;;  %v1109_v16 = vsub.f32 %v35_v2, %v1082_v6  ;;  %808 = vmatpush3.msra.mxu0 %v1080_v5  ;;  %v1112_v17 = vand.u32 4294901760, %v31_v13  ;;  %v30_v18 = vld [vmem:[%s1487_s1 + $0x48] sm:$0xff]  ;;  %v29_v26 = vld [vmem:[%s1487_s1 + $0x40] sm:$0xff] }
   0x5   :  { %16 = vmax.xlane.f32.xlu0 %v15_v14  ;;  %v1118_v19 = vsub.f32 %v34_v7, %v1094_v10  ;;  %v1121_v20 = vsub.f32 %v33_v8, %v1096_v11  ;;  %v1124_v21 = vsub.f32 %v32_v9, %v1098_v12  ;;  %809 = vmatprep.subr.mxu0 %v1048_v4  ;;  %v1127_v22 = vand.u32 4294901760, %v30_v18  ;;  %v28_v36 = vld [vmem:[%s1487_s1 + $0x38] sm:$0xff]  ;;  %v27_v41 = vld [vmem:[%s1487_s1 + $0x30] sm:$0xff]  ;;  %v26_v47 = vld [vmem:[%s1487_s1 + $0x28] sm:$0xff]  ;;  %s1051_s14 = smov 120   ;;  %s1052_s15 = smov [#allocation2]  }
   0x6   :  { %v131_v23 = vand.u32 4294901760, %v1106_v15  ;;  %v138_v24 = vand.u32 4294901760, %v1109_v16  ;;  %810 = vmatpush3.msra.mxu0 %v1082_v6  ;;  %v1133_v25 = vsub.f32 %v31_v13, %v1112_v17  ;;  %v1152_v33 = vand.u32 4294901760, %v29_v26  ;;  %v25_v54 = vld [vmem:[%s1487_s1 + $0x20] sm:$0xff]  ;;  %v24_v60 = vld [vmem:[%s1487_s1 + $0x18] sm:$0xff]  ;;  %v23_v2 = vld [vmem:[%s1487_s1 + $0x10] sm:$0xff] }
   0x7   :  { %v145_v27 = vand.u32 4294901760, %v1118_v19  ;;  %v152_v28 = vand.u32 4294901760, %v1121_v20  ;;  %811 = vmatprep.subr.mxu0 %v1048_v4  ;;  %v1142_v29 = vsub.f32 %v30_v18, %v1127_v22  ;;  %v159_v32 = vand.u32 4294901760, %v1124_v21  ;;  %v22_v9 = vld [vmem:[%s1487_s1 + $0x8] sm:$0xff]  ;;  %v21_v13 = vld [vmem:[%s1487_s1] sm:$0xff]  ;;  %s1050_s1 = smov 8  }
   0x8   :  { %v132_v30 = vsub.f32 %v1106_v15, %v131_v23  ;;  %v139_v31 = vsub.f32 %v1109_v16, %v138_v24  ;;  %812 = vmatpush3.msra.mxu0 %v1094_v10  ;;  %v166_v35 = vand.u32 4294901760, %v1133_v25  ;;  %v1167_v40 = vsub.f32 %v29_v26, %v1152_v33  ;;  %s697_s0 = sshll.u32 %s1052_s15, 4  ;;  %s698_s0 = int_to_ptr.vmem [resolvable:$true] %s697_s0 }
   0x9   :  { %v146_v34 = vsub.f32 %v1118_v19, %v145_v27  ;;  %813 = vmatprep.subr.mxu0 %v1048_v4  ;;  %v153_v39 = vsub.f32 %v1121_v20, %v152_v28  ;;  %v173_v42 = vand.u32 4294901760, %v1142_v29  ;;  %v160_v44 = vsub.f32 %v1124_v21, %v159_v32  ;;  %s1026_s16 = scalar_lea.vmem %s698_s0, 32  ;;  %p1031_p1 = scmp.lt.s32.totalorder %s698_s0, %s698_s0 }
   0xa   :  { %v133_v37 = vand.u32 4294901760, %v132_v30  ;;  %v140_v38 = vand.u32 4294901760, %v139_v31  ;;  %814 = vmatpush3.msra.mxu0 %v1096_v11  ;;  %v1178_v45 = vand.u32 4294901760, %v28_v36  ;;  %v1180_v46 = vand.u32 4294901760, %v27_v41  ;;  %p1027_p0 = scmp.ne.s32.totalorder %s698_s0, %s1026_s16  ;;  %p1032_p2 = scmp.lt.s32.totalorder %s1026_s16, %s1026_s16 }
   0xb   :  { %815 = vmatprep.subr.mxu0 %v1048_v4  ;;  %v147_v43 = vand.u32 4294901760, %v146_v34  ;;  %v180_v48 = vand.u32 4294901760, %v1167_v40  ;;  %v1188_v49 = vand.u32 4294901760, %v26_v47  ;;  %v154_v50 = vand.u32 4294901760, %v153_v39 }
   0xc   :  { %843 = vmatpush3.msra.mxu1 %v133_v37  ;;  %816 = vmatpush3.msra.mxu0 %v1098_v12  ;;  %v167_v51 = vsub.f32 %v1133_v25, %v166_v35  ;;  %v1194_v52 = vsub.f32 %v28_v36, %v1178_v45  ;;  %v1198_v53 = vsub.f32 %v27_v41, %v1180_v46  ;;  %v1208_v56 = vand.u32 4294901760, %v25_v54  ;;  %p1033_p3 = por %p1032_p2, %p1031_p1 }
   0xd   :  { %844 = vmatprep.subr.mxu1 %v1048_v4  ;;  %817 = vmatprep.subr.mxu0 %v1048_v4  ;;  %v174_v55 = vsub.f32 %v1142_v29, %v173_v42  ;;  %v161_v57 = vand.u32 4294901760, %v160_v44  ;;  %v1213_v59 = vsub.f32 %v26_v47, %v1188_v49  ;;  %v181_v61 = vsub.f32 %v1167_v40, %v180_v48 }
   0xe   :  { %845 = vmatpush3.msra.mxu1 %v140_v38  ;;  %818 = vmatpush3.msra.mxu0 %v1112_v17  ;;  %v187_v58 = vand.u32 4294901760, %v1194_v52  ;;  %v1223_v62 = vand.u32 4294901760, %v24_v60  ;;  %v168_v63 = vand.u32 4294901760, %v167_v51  ;;  %v194_v0 = vand.u32 4294901760, %v1198_v53  ;;  %p1034_p4 = pnand %p1033_p3, %p1027_p0 }
   0xf   :  { %846 = vmatprep.subr.mxu1 %v1048_v4  ;;  %819 = vmatprep.subr.mxu0 %v1048_v4  ;;  %v1228_v1 = vsub.f32 %v25_v54, %v1208_v56  ;;  %v175_v7 = vand.u32 4294901760, %v174_v55  ;;  %v1235_v8 = vand.u32 4294901760, %v23_v2  ;;  %v201_v18 = vand.u32 4294901760, %v1213_v59 }
  0x10   :  { %847 = vmatpush3.msra.mxu1 %v147_v43  ;;  %820 = vmatpush3.msra.mxu0 %v1127_v22  ;;  %v188_v14 = vsub.f32 %v1194_v52, %v187_v58  ;;  %v1249_v26 = vsub.f32 %v24_v60, %v1223_v62  ;;  %v1251_v30 = vand.u32 4294901760, %v22_v9  ;;  %v182_v31 = vand.u32 4294901760, %v181_v61 }
  0x11   :  { %848 = vmatprep.subr.mxu1 %v1048_v4  ;;  %821 = vmatprep.subr.mxu0 %v1048_v4  ;;  %v195_v34 = vsub.f32 %v1198_v53, %v194_v0  ;;  %v208_v36 = vand.u32 4294901760, %v1228_v1  ;;  %v1261_v37 = vsub.f32 %v23_v2, %v1235_v8  ;;  %v1263_v38 = vand.u32 4294901760, %v21_v13 }
  0x12   :  { %849 = vmatpush3.msra.mxu1 %v154_v50  ;;  %822 = vmatpush3.msra.mxu0 %v1152_v33  ;;  %v189_v39 = vand.u32 4294901760, %v188_v14  ;;  %v202_v41 = vsub.f32 %v1213_v59, %v201_v18  ;;  %v215_v43 = vand.u32 4294901760, %v1249_v26  ;;  %v1273_v44 = vsub.f32 %v22_v9, %v1251_v30 }
  0x13   :  { %850 = vmatprep.subr.mxu1 %v1048_v4  ;;  %823 = vmatprep.subr.mxu0 %v1048_v4  ;;  %v196_v47 = vand.u32 4294901760, %v195_v34  ;;  %v209_v50 = vsub.f32 %v1228_v1, %v208_v36  ;;  %v222_v51 = vand.u32 4294901760, %v1261_v37  ;;  %v1283_v54 = vsub.f32 %v21_v13, %v1263_v38 }
  0x14   :  { %851 = vmatpush3.msra.mxu1 %v161_v57  ;;  %824 = vmatpush3.msra.mxu0 %v1178_v45  ;;  %v203_v55 = vand.u32 4294901760, %v202_v41  ;;  %v216_v57 = vsub.f32 %v1249_v26, %v215_v43  ;;  %v229_v60 = vand.u32 4294901760, %v1273_v44  ;;  %vm1049_vm1 = vmmov 0  }
  0x15   :  { %852 = vmatprep.subr.mxu1 %v1048_v4  ;;  %825 = vmatprep.subr.mxu0 %v1048_v4  ;;  %v210_v61 = vand.u32 4294901760, %v209_v50  ;;  %v236_v2 = vand.u32 4294901760, %v1283_v54  ;;  %vm689_vm2 = vcmask 58368  }
  0x16   :  { %853 = vmatpush3.msra.mxu1 %v168_v63  ;;  %826 = vmatpush3.msra.mxu0 %v1180_v46  ;;  %v223_v63 = vsub.f32 %v1261_v37, %v222_v51  ;;  %v230_v9 = vsub.f32 %v1273_v44, %v229_v60 }
  0x17   :  { %854 = vmatprep.subr.mxu1 %v1048_v4  ;;  %827 = vmatprep.subr.mxu0 %v1048_v4  ;;  %v237_v14 = vsub.f32 %v1283_v54, %v236_v2 }
  0x18   :  { %855 = vmatpush3.msra.mxu1 %v175_v7  ;;  %828 = vmatpush3.msra.mxu0 %v1188_v49  ;;  %v217_v7 = vand.u32 4294901760, %v216_v57  ;;  %v224_v13 = vand.u32 4294901760, %v223_v63 }
  0x19   :  { %856 = vmatprep.subr.mxu1 %v1048_v4  ;;  %829 = vmatprep.subr.mxu0 %v1048_v4  ;;  %v238_v34 = vand.u32 4294901760, %v237_v14 }
  0x1a   :  { %857 = vmatpush3.msra.mxu1 %v182_v31  ;;  %830 = vmatpush3.msra.mxu0 %v1208_v56  ;;  %v231_v31 = vand.u32 4294901760, %v230_v9 }
  0x1b   :  { %858 = vmatprep.subr.mxu1 %v1048_v4  ;;  %831 = vmatprep.subr.mxu0 %v1048_v4 }
  0x1c   :  { %859 = vmatpush3.msra.mxu1 %v189_v39  ;;  %874 = vmatprep.mubr.msk.f32.mxu1 %vm1049_vm1, %v1048_v4 }
  0x1d   :  { %860 = vmatprep.subr.mxu1 %v1048_v4  ;;  %832 = vmatpush3.msra.mxu0 %v1223_v62 }
  0x1e   :  { %861 = vmatpush3.msra.mxu1 %v196_v47  ;;  %833 = vmatprep.subr.mxu0 %v1048_v4 }
  0x1f   :  { %862 = vmatprep.subr.mxu1 %v1048_v4  ;;  %834 = vmatpush3.msra.mxu0 %v1235_v8 }
  0x20   :  { %863 = vmatpush3.msra.mxu1 %v203_v55  ;;  %835 = vmatprep.subr.mxu0 %v1048_v4 }
  0x21   :  { %864 = vmatprep.subr.mxu1 %v1048_v4  ;;  %836 = vmatpush3.msra.mxu0 %v1251_v30 }
  0x22   :  { %865 = vmatpush3.msra.mxu1 %v210_v61  ;;  %837 = vmatprep.subr.mxu0 %v1048_v4 }
  0x23   :  { %866 = vmatprep.subr.mxu1 %v1048_v4  ;;  %838 = vmatpush3.msra.mxu0 %v1263_v38 }
  0x24   :  { %867 = vmatpush3.msra.mxu1 %v217_v7  ;;  %839 = vmatprep.mubr.msk.f32.mxu0 %vm1049_vm1, %v1048_v4 }
  0x25   :  { %868 = vmatprep.subr.mxu1 %v1048_v4  ;;  %877 = vmatprep.subr.mxu0 %v1048_v4 }
  0x26   :  { %869 = vmatpush3.msra.mxu1 %v224_v13 }
  0x27   :  { %870 = vmatprep.subr.mxu1 %v1048_v4 }
  0x28   :  { %871 = vmatpush3.msra.mxu1 %v231_v31 }
  0x29   :  { %872 = vmatprep.subr.mxu1 %v1048_v4 }
  0x2a   :  { %873 = vmatpush3.msra.mxu1 %v238_v34 }
  0x2b   :  { %912 = vmatprep.subr.mxu1 %v1048_v4 }
  0x8e   :  { %v17_v39 = vpop.xlane.xlu0 %16 }
  0x8f   :  { %v18_v41 = vsub.f32 %v1077_v3, %v17_v39 }
  0x91   :  { %v19_v47 = vmul.f32 1.442695, %v18_v41 }
  0x93   :  { %1022 = vpow2.f32 %v19_v47 }
  0xa0   :  { %v1023_v50 = vpop.eup %1022 }
  0xa1   :  { %v1322_v55 = vand.u32 4294901760, %v1023_v50 }
  0xa3   :  { %875 = vmatmul.mubr.f32.vlgmr.msra.gmra.mxu1 %v1322_v55  ;;  %v1326_v57 = vsub.f32 %v1023_v50, %v1322_v55 }
  0xa4   :  { %913 = vmatpush3.msra.mxu1 %v1080_v5  ;;  %944 = vmatprep.mubr.msk.f32.mxu1 %vm1049_vm1, %v1048_v4 }
  0xa5   :  { %914 = vmatprep.subr.mxu1 %v1048_v4  ;;  %v120_v61 = vand.u32 4294901760, %v1326_v57 }
  0xa6   :  { %915 = vmatpush3.msra.mxu1 %v1082_v6 }
  0xa7   :  { %916 = vmatprep.subr.mxu1 %v1048_v4  ;;  %v121_v3 = vsub.f32 %v1326_v57, %v120_v61 }
  0xa8   :  { %917 = vmatpush3.msra.mxu1 %v1094_v10 }
  0xa9   :  { %918 = vmatprep.subr.mxu1 %v1048_v4  ;;  %v122_v63 = vand.u32 4294901760, %v121_v3 }
  0xaa   :  { %919 = vmatpush3.msra.mxu1 %v1096_v11 }
  0xab   :  { %920 = vmatprep.subr.mxu1 %v1048_v4  ;;  %840 = vmatmul.mubr.f32.vlgmr.msra.gmra.mxu0 %v122_v63 }
  0xac   :  { %878 = vmatpush3.msra.mxu0 %v1106_v15  ;;  %921 = vmatpush3.msra.mxu1 %v1098_v12 }
  0xad   :  { %879 = vmatprep.subr.mxu0 %v1048_v4  ;;  %922 = vmatprep.subr.mxu1 %v1048_v4 }
  0xae   :  { %880 = vmatpush3.msra.mxu0 %v1109_v16  ;;  %923 = vmatpush3.msra.mxu1 %v1112_v17 }
  0xaf   :  { %881 = vmatprep.subr.mxu0 %v1048_v4  ;;  %924 = vmatprep.subr.mxu1 %v1048_v4 }
  0xb0   :  { %882 = vmatpush3.msra.mxu0 %v1118_v19  ;;  %925 = vmatpush3.msra.mxu1 %v1127_v22 }
  0xb1   :  { %883 = vmatprep.subr.mxu0 %v1048_v4  ;;  %926 = vmatprep.subr.mxu1 %v1048_v4 }
  0xb2   :  { %884 = vmatpush3.msra.mxu0 %v1121_v20  ;;  %927 = vmatpush3.msra.mxu1 %v1152_v33 }
  0xb3   :  { %885 = vmatprep.subr.mxu0 %v1048_v4  ;;  %928 = vmatprep.subr.mxu1 %v1048_v4 }
  0xb4   :  { %886 = vmatpush3.msra.mxu0 %v1124_v21  ;;  %929 = vmatpush3.msra.mxu1 %v1178_v45 }
  0xb5   :  { %887 = vmatprep.subr.mxu0 %v1048_v4  ;;  %930 = vmatprep.subr.mxu1 %v1048_v4 }
  0xb6   :  { %888 = vmatpush3.msra.mxu0 %v1133_v25  ;;  %931 = vmatpush3.msra.mxu1 %v1180_v46 }
  0xb7   :  { %889 = vmatprep.subr.mxu0 %v1048_v4  ;;  %932 = vmatprep.subr.mxu1 %v1048_v4 }
  0xb8   :  { %890 = vmatpush3.msra.mxu0 %v1142_v29  ;;  %933 = vmatpush3.msra.mxu1 %v1188_v49 }
  0xb9   :  { %891 = vmatprep.subr.mxu0 %v1048_v4  ;;  %934 = vmatprep.subr.mxu1 %v1048_v4 }
  0xba   :  { %892 = vmatpush3.msra.mxu0 %v1167_v40  ;;  %935 = vmatpush3.msra.mxu1 %v1208_v56 }
  0xbb   :  { %893 = vmatprep.subr.mxu0 %v1048_v4  ;;  %936 = vmatprep.subr.mxu1 %v1048_v4 }
  0xbc   :  { %894 = vmatpush3.msra.mxu0 %v1194_v52  ;;  %937 = vmatpush3.msra.mxu1 %v1223_v62 }
  0xbd   :  { %895 = vmatprep.subr.mxu0 %v1048_v4  ;;  %938 = vmatprep.subr.mxu1 %v1048_v4 }
  0xbe   :  { %896 = vmatpush3.msra.mxu0 %v1198_v53  ;;  %939 = vmatpush3.msra.mxu1 %v1235_v8 }
  0xbf   :  { %897 = vmatprep.subr.mxu0 %v1048_v4  ;;  %940 = vmatprep.subr.mxu1 %v1048_v4 }
  0xc0   :  { %898 = vmatpush3.msra.mxu0 %v1213_v59  ;;  %941 = vmatpush3.msra.mxu1 %v1251_v30 }
  0xc1   :  { %899 = vmatprep.subr.mxu0 %v1048_v4  ;;  %942 = vmatprep.subr.mxu1 %v1048_v4 }
  0xc2   :  { %900 = vmatpush3.msra.mxu0 %v1228_v1  ;;  %943 = vmatpush3.msra.mxu1 %v1263_v38 }
  0xc3   :  { %901 = vmatprep.subr.mxu0 %v1048_v4  ;;  %945 = vmatmul.mubr.f32.vlgmr.msra.gmra.mxu1 %v120_v61 }
  0xc4   :  { %982 = vmatprep.subr.mxu1 %v1048_v4  ;;  %902 = vmatpush3.msra.mxu0 %v1249_v26 }
  0xc5   :  { %983 = vmatpush3.msra.mxu1 %v1080_v5  ;;  %903 = vmatprep.subr.mxu0 %v1048_v4 }
  0xc6   :  { %984 = vmatprep.subr.mxu1 %v1048_v4  ;;  %904 = vmatpush3.msra.mxu0 %v1261_v37 }
  0xc7   :  { %985 = vmatpush3.msra.mxu1 %v1082_v6  ;;  %905 = vmatprep.subr.mxu0 %v1048_v4 }
  0xc8   :  { %986 = vmatprep.subr.mxu1 %v1048_v4  ;;  %906 = vmatpush3.msra.mxu0 %v1273_v44 }
  0xc9   :  { %987 = vmatpush3.msra.mxu1 %v1094_v10  ;;  %907 = vmatprep.subr.mxu0 %v1048_v4 }
  0xca   :  { %988 = vmatprep.subr.mxu1 %v1048_v4  ;;  %908 = vmatpush3.msra.mxu0 %v1283_v54 }
  0xcb   :  { %909 = vmatprep.mubr.msk.f32.mxu0 %vm1049_vm1, %v1048_v4  ;;  %989 = vmatpush3.msra.mxu1 %v1096_v11 }
  0xcc   :  { %910 = vmatmul.mubr.f32.vlgmr.msra.gmra.mxu0 %v1326_v57  ;;  %947 = vmatprep.subr.mxu0 %v1048_v4 }
  0xcd   :  { %990 = vmatprep.subr.mxu1 %v1048_v4  ;;  %948 = vmatpush3.msra.mxu0 %v131_v23 }
  0xce   :  { %991 = vmatpush3.msra.mxu1 %v1098_v12  ;;  %949 = vmatprep.subr.mxu0 %v1048_v4 }
  0xcf   :  { %992 = vmatprep.subr.mxu1 %v1048_v4  ;;  %950 = vmatpush3.msra.mxu0 %v138_v24 }
  0xd0   :  { %993 = vmatpush3.msra.mxu1 %v1112_v17  ;;  %951 = vmatprep.subr.mxu0 %v1048_v4 }
  0xd1   :  { %994 = vmatprep.subr.mxu1 %v1048_v4  ;;  %952 = vmatpush3.msra.mxu0 %v145_v27 }
  0xd2   :  { %995 = vmatpush3.msra.mxu1 %v1127_v22  ;;  %953 = vmatprep.subr.mxu0 %v1048_v4 }
  0xd3   :  { %996 = vmatprep.subr.mxu1 %v1048_v4  ;;  %954 = vmatpush3.msra.mxu0 %v152_v28 }
  0xd4   :  { %997 = vmatpush3.msra.mxu1 %v1152_v33  ;;  %955 = vmatprep.subr.mxu0 %v1048_v4 }
  0xd5   :  { %998 = vmatprep.subr.mxu1 %v1048_v4  ;;  %956 = vmatpush3.msra.mxu0 %v159_v32 }
  0xd6   :  { %999 = vmatpush3.msra.mxu1 %v1178_v45  ;;  %957 = vmatprep.subr.mxu0 %v1048_v4 }
  0xd7   :  { %1000 = vmatprep.subr.mxu1 %v1048_v4  ;;  %958 = vmatpush3.msra.mxu0 %v166_v35 }
  0xd8   :  { %1001 = vmatpush3.msra.mxu1 %v1180_v46  ;;  %959 = vmatprep.subr.mxu0 %v1048_v4 }
  0xd9   :  { %1002 = vmatprep.subr.mxu1 %v1048_v4  ;;  %960 = vmatpush3.msra.mxu0 %v173_v42 }
  0xda   :  { %1003 = vmatpush3.msra.mxu1 %v1188_v49  ;;  %961 = vmatprep.subr.mxu0 %v1048_v4 }
  0xdb   :  { %1004 = vmatprep.subr.mxu1 %v1048_v4  ;;  %962 = vmatpush3.msra.mxu0 %v180_v48 }
  0xdc   :  { %1005 = vmatpush3.msra.mxu1 %v1208_v56  ;;  %963 = vmatprep.subr.mxu0 %v1048_v4 }
  0xdd   :  { %1006 = vmatprep.subr.mxu1 %v1048_v4  ;;  %964 = vmatpush3.msra.mxu0 %v187_v58 }
  0xde   :  { %1007 = vmatpush3.msra.mxu1 %v1223_v62  ;;  %965 = vmatprep.subr.mxu0 %v1048_v4 }
  0xdf   :  { %1008 = vmatprep.subr.mxu1 %v1048_v4  ;;  %966 = vmatpush3.msra.mxu0 %v194_v0 }
  0xe0   :  { %1009 = vmatpush3.msra.mxu1 %v1235_v8  ;;  %967 = vmatprep.subr.mxu0 %v1048_v4 }
  0xe1   :  { %1010 = vmatprep.subr.mxu1 %v1048_v4  ;;  %968 = vmatpush3.msra.mxu0 %v201_v18 }
  0xe2   :  { %1011 = vmatpush3.msra.mxu1 %v1251_v30  ;;  %969 = vmatprep.subr.mxu0 %v1048_v4 }
  0xe3   :  { %1012 = vmatprep.subr.mxu1 %v1048_v4  ;;  %970 = vmatpush3.msra.mxu0 %v208_v36 }
  0xe4   :  { %1013 = vmatpush3.msra.mxu1 %v1263_v38  ;;  %1014 = vmatprep.mubr.msk.f32.mxu1 %vm1049_vm1, %v1048_v4 }
  0xe5   :  { %971 = vmatprep.subr.mxu0 %v1048_v4  ;;  %1015 = vmatmul.mubr.f32.vlgmr.msra.gmra.mxu1 %v1322_v55 }
  0xe6   :  { %972 = vmatpush3.msra.mxu0 %v215_v43  ;;  %979 = vmatprep.mubr.msk.f32.mxu0 %vm1049_vm1, %v1048_v4 }
  0xe7   :  { %973 = vmatprep.subr.mxu0 %v1048_v4 }
  0xe8   :  { %974 = vmatpush3.msra.mxu0 %v222_v51 }
  0xe9   :  { %975 = vmatprep.subr.mxu0 %v1048_v4 }
  0xea   :  { %976 = vmatpush3.msra.mxu0 %v229_v60 }
  0xeb   :  { %977 = vmatprep.subr.mxu0 %v1048_v4 }
  0xec   :  { %978 = vmatpush3.msra.mxu0 %v236_v2 }
  0xed   :  { %980 = vmatmul.mubr.f32.vlgmr.msra.gmra.mxu0 %v1322_v55 }
 0x163   :  { %v275_v5 = vpop.f32.mrf.mxu1 }
 0x165   :  { %v876_v6 = vpop.f32.mrf.mxu1 }
 0x16b   :  { %v124_v10 = vpop.f32.mrf.mxu0 }
 0x16c   :  { %v276_v20 = vadd.f32 %v275_v5, %v124_v10 }
 0x16d   :  { %v841_v11 = vpop.f32.mrf.mxu0 }
 0x183   :  { %v468_v12 = vpop.f32.mrf.mxu1 }
 0x185   :  { %v946_v15 = vpop.f32.mrf.mxu1 }
 0x18c   :  { %v379_v16 = vpop.f32.mrf.mxu0 }
 0x18d   :  { %v380_v22 = vadd.f32 %v379_v16, %v276_v20 }
 0x18e   :  { %v911_v17 = vpop.f32.mrf.mxu0 }
 0x18f   :  { %v469_v23 = vadd.f32 %v468_v12, %v380_v22 }
 0x1a5   :  { %v674_v19 = vpop.f32.mrf.mxu1 }
 0x1a7   :  { %v1016_v21 = vpop.f32.mrf.mxu1 }
 0x1ad   :  { %v587_v24 = vpop.f32.mrf.mxu0 }
 0x1ae   :  { %v588_v4 = vadd.f32 %v587_v24, %v469_v23 }
 0x1af   :  { %v981_v25 = vpop.f32.mrf.mxu0 }
 0x1b0   :  { %v675_v27 = vadd.f32 %v674_v19, %v588_v4 }
 0x1b2   :  { %v678_v28 = vmax.f32 %v675_v27, 1e-30 }
 0x1b4   :  { %680 = vrot.lane.b32.xlu0 %v678_v28, %s1050_s1 }
 0x226   :  { %v681_v29 = vpop.permute.xlu0 %680 }
 0x227   :  { %1024 = vrcp.f32 %v681_v29 }
 0x234   :  { %v1025_v32 = vpop.eup %1024 }
 0x235   :  { %v684_v33 = vmul.f32 %v1025_v32, %v675_v27 }
 0x237   :  { %686 = vrot.lane.b32.xlu1 %v684_v33, %s1051_s14 }
 0x2a9   :  { %v687_v35 = vpop.permute.xlu1 %686 }
 0x2aa   :  { %690 = vst.msk [vmem:[#allocation2] sm:$0x3] %vm689_vm2, %v687_v35 }
 0x2ab   :  { %1037 = shalt.err (!%p1034_p4)
}
 0x2ac   :  { %700 = dma.vmem_to_hbm [thread:$0]  %s698_s0, 32, %s1488_s2, [#allocation3]  }
 0x2ad   :  { %1046 = dma.done.wait [#allocation3], 32  }
 0x2ae   :  { %1047 = vsyncadd [#allocation3], 4294967264 }
 0x2af   :  { %704 = vsyncpa [#allocation3], 1 }

</bundles_post_ra>
